<compile_context>
chip_gen: v7x
topology: tpu7x:2x2x1
jax: 0.10.0
libtpu: 0.0.40
codegen_flags: <defaults>
</compile_context>

<pallas_src>
import functools
import math

import jax
import jax.numpy as jnp
from jax.experimental import pallas as pl
from jax.experimental.pallas import tpu as pltpu


_SQRT_2_OVER_PI = math.sqrt(2.0 / math.pi)


def _gelu_f32(x):
    # 0.5 * x * (1 + tanh(sqrt(2/pi) * (x + 0.044715 * x^3)))  -- GPT-2 tanh approx.
    inner = _SQRT_2_OVER_PI * (x + 0.044715 * (x * x * x))
    return 0.5 * x * (1.0 + jnp.tanh(inner))


def _matmul_bias_act_kernel(x_ref, w_ref, b_ref, o_ref, acc_ref, *, apply_gelu):
    """One (tm, tn) output tile of  act(x @ w + b), accumulated over the K grid axis."""
    k = pl.program_id(2)

    @pl.when(k == 0)
    def _init():
        acc_ref[...] = jnp.zeros_like(acc_ref)

    acc_ref[...] += jnp.dot(
        x_ref[...], w_ref[...], preferred_element_type=jnp.float32
    )

    @pl.when(k == pl.num_programs(2) - 1)
    def _finalize():
        acc = acc_ref[...] + b_ref[...].astype(jnp.float32)  # (1, tn) broadcasts
        if apply_gelu:
            acc = _gelu_f32(acc)  # fused GELU epilogue (f32, then single downcast)
        o_ref[...] = acc.astype(o_ref.dtype)


def _pick_tile(dim, candidates):
    """Largest candidate that divides `dim`; otherwise the full dim (no padding)."""
    for c in candidates:
        if dim % c == 0:
            return c
    return dim


def _linear(x2d, w, b, *, apply_gelu, out_dtype):
    """y = act(x2d @ w + b) via a tiled Pallas matmul with fused epilogue."""
    M, K = x2d.shape
    Kw, N = w.shape
    assert K == Kw, (K, Kw)

    # Tiles: biggest divisor <= 512 (keeps double-buffered VMEM well under the
    # v5e 16 MiB scoped default; on v6e/v7x there is ample headroom).
    tm = _pick_tile(M, (512, 256, 128, 64, 32, 16, 8))
    tk = _pick_tile(K, (512, 256, 128))
    tn = _pick_tile(N, (512, 256, 128))

    grid = (M // tm, N // tn, K // tk)
    kernel = functools.partial(_matmul_bias_act_kernel, apply_gelu=apply_gelu)

    return pl.pallas_call(
        kernel,
        out_shape=jax.ShapeDtypeStruct((M, N), out_dtype),
        grid=grid,
        in_specs=[
            pl.BlockSpec((tm, tk), lambda i, j, k: (i, k)),   # x tile
            pl.BlockSpec((tk, tn), lambda i, j, k: (k, j)),   # w tile
            pl.BlockSpec((1, tn), lambda i, j, k: (0, j)),    # bias row
        ],
        out_specs=pl.BlockSpec((tm, tn), lambda i, j, k: (i, j)),
        scratch_shapes=[pltpu.VMEM((tm, tn), jnp.float32)],
        compiler_params=pltpu.CompilerParams(
            dimension_semantics=("parallel", "parallel", "arbitrary")
        ),
    )(x2d, w, b.reshape(1, -1))


def feed_forward_pallas(x, w1, b1, w2, b2):
    """FeedForward: Linear(emb -> 4*emb) -> GELU (fused) -> Linear(4*emb -> emb).

    Weights are stored (in_features, out_features), i.e. already transposed
    relative to torch.nn.Linear's (out, in) storage; the math is identical.
    """
    orig_shape = x.shape
    emb = orig_shape[-1]
    x2d = x.reshape(-1, emb)  # (rows, emb) -- last dim on lanes

    h = _linear(x2d, w1, b1, apply_gelu=True, out_dtype=x.dtype)   # (rows, 4*emb)
    y = _linear(h, w2, b2, apply_gelu=False, out_dtype=x.dtype)    # (rows, emb)
    return y.reshape(orig_shape)


def feed_forward_reference(x, w1, b1, w2, b2):
    """Pure-JAX reference matching the PyTorch module."""
    h = x @ w1 + b1
    h = 0.5 * h * (1.0 + jnp.tanh(_SQRT_2_OVER_PI * (h + 0.044715 * jnp.power(h, 3))))
    return h @ w2 + b2


if __name__ == "__main__":
    key = jax.random.PRNGKey(0)
    k_x, k_w1, k_b1, k_w2, k_b2 = jax.random.split(key, 5)

    # Small GPT-2-style config: batch=2, seq=8, emb_dim=32 (hidden = 4*emb = 128).
    batch, seq, emb = 2, 8, 32
    hidden = 4 * emb

    x = jax.random.normal(k_x, (batch, seq, emb), dtype=jnp.float32)
    w1 = 0.02 * jax.random.normal(k_w1, (emb, hidden), dtype=jnp.float32)
    b1 = 0.02 * jax.random.normal(k_b1, (hidden,), dtype=jnp.float32)
    w2 = 0.02 * jax.random.normal(k_w2, (hidden, emb), dtype=jnp.float32)
    b2 = 0.02 * jax.random.normal(k_b2, (emb,), dtype=jnp.float32)

    y = feed_forward_pallas(x, w1, b1, w2, b2)
    y = jax.block_until_ready(y)

    y_ref = feed_forward_reference(x, w1, b1, w2, b2)
    assert y.shape == x.shape and y.dtype == x.dtype
    assert jnp.allclose(y, y_ref, atol=5e-3, rtol=5e-3), (
        "mismatch vs reference: max abs err = %e"
        % float(jnp.max(jnp.abs(y - y_ref)))
    )

    print("KERNEL_OK")
</pallas_src>

<mosaic_0001>
module attributes {stable_mosaic.version = 11 : i64} {
  func.func @_matmul_bias_act_kernel(%arg0: i32, %arg1: i32, %arg2: i32, %arg3: memref<16x32xf32, #tpu.memory_space<vmem>>, %arg4: memref<32x128xf32, #tpu.memory_space<vmem>>, %arg5: memref<1x128xf32, #tpu.memory_space<vmem>>, %arg6: memref<16x128xf32, #tpu.memory_space<vmem>>, %arg7: memref<16x128xf32, #tpu.memory_space<vmem>>) attributes {dimension_semantics = [#tpu.dimension_semantics<parallel>, #tpu.dimension_semantics<parallel>, #tpu.dimension_semantics<arbitrary>], iteration_bounds = array<i64: 1, 1, 1>, scalar_prefetch = 0 : i64, scratch_operands = 1 : i64, tpu.core_type = #tpu.core_type<tc>, window_params = [{transform_indices = @transform_0, window_bounds = array<i64: 16, 32>}, {transform_indices = @transform_1, window_bounds = array<i64: 32, 128>}, {transform_indices = @transform_2, window_bounds = array<i64: 1, 128>}, {transform_indices = @transform_3, window_bounds = array<i64: 16, 128>}]} {
    %c0_i32 = arith.constant 0 : i32
    %0 = arith.cmpi eq, %arg2, %c0_i32 : i32
    %1 = arith.extui %0 : i1 to i32
    %c0_i32_0 = arith.constant 0 : i32
    %2 = arith.cmpi ne, %1, %c0_i32_0 : i32
    scf.if %2 {
      %cst_10 = arith.constant 0.000000e+00 : f32
      %12 = vector.broadcast %cst_10 : f32 to vector<16x128xf32>
      %c0_11 = arith.constant 0 : index
      %c0_12 = arith.constant 0 : index
      %13 = vector.load %arg7[%c0_11, %c0_12] : memref<16x128xf32, #tpu.memory_space<vmem>>, vector<16x128xf32>
      tpu.vector_store %arg7[%c0_11, %c0_12], %12 {strides = array<i32>} : memref<16x128xf32, #tpu.memory_space<vmem>>, vector<16x128xf32>,
    } else {
    }
    %c0 = arith.constant 0 : index
    %c0_1 = arith.constant 0 : index
    %3 = vector.load %arg7[%c0, %c0_1] : memref<16x128xf32, #tpu.memory_space<vmem>>, vector<16x128xf32>
    %c0_2 = arith.constant 0 : index
    %c0_3 = arith.constant 0 : index
    %4 = vector.load %arg3[%c0_2, %c0_3] : memref<16x32xf32, #tpu.memory_space<vmem>>, vector<16x32xf32>
    %c0_4 = arith.constant 0 : index
    %c0_5 = arith.constant 0 : index
    %5 = vector.load %arg4[%c0_4, %c0_5] : memref<32x128xf32, #tpu.memory_space<vmem>>, vector<32x128xf32>
    %cst = arith.constant dense<0.000000e+00> : vector<16x128xf32>
    %6 = tpu.matmul %4, %5, %cst {dimension_numbers = #tpu.dot_dimension_numbers<[1], [0], [0], [1], [0, 0, 1, 1], [], []>} : vector<16x32xf32>, vector<32x128xf32>, vector<16x128xf32> -> vector<16x128xf32>
    %7 = arith.addf %3, %6 : vector<16x128xf32>
    %c0_6 = arith.constant 0 : index
    %c0_7 = arith.constant 0 : index
    %8 = vector.load %arg7[%c0_6, %c0_7] : memref<16x128xf32, #tpu.memory_space<vmem>>, vector<16x128xf32>
    tpu.vector_store %arg7[%c0_6, %c0_7], %7 {strides = array<i32>} : memref<16x128xf32, #tpu.memory_space<vmem>>, vector<16x128xf32>,
    %c0_i32_8 = arith.constant 0 : i32
    %9 = arith.cmpi eq, %arg2, %c0_i32_8 : i32
    %10 = arith.extui %9 : i1 to i32
    %c0_i32_9 = arith.constant 0 : i32
    %11 = arith.cmpi ne, %10, %c0_i32_9 : i32
    scf.if %11 {
      %c0_10 = arith.constant 0 : index
      %c0_11 = arith.constant 0 : index
      %12 = vector.load %arg7[%c0_10, %c0_11] : memref<16x128xf32, #tpu.memory_space<vmem>>, vector<16x128xf32>
      %c0_12 = arith.constant 0 : index
      %c0_13 = arith.constant 0 : index
      %13 = vector.load %arg5[%c0_12, %c0_13] : memref<1x128xf32, #tpu.memory_space<vmem>>, vector<1x128xf32>
      %14 = vector.broadcast %13 : vector<1x128xf32> to vector<16x128xf32>
      %15 = arith.addf %12, %14 : vector<16x128xf32>
      %16 = arith.mulf %15, %15 : vector<16x128xf32>
      %17 = arith.mulf %16, %15 : vector<16x128xf32>
      %cst_14 = arith.constant 4.471500e-02 : f32
      %18 = vector.broadcast %cst_14 : f32 to vector<16x128xf32>
      %19 = arith.mulf %18, %17 : vector<16x128xf32>
      %20 = arith.addf %15, %19 : vector<16x128xf32>
      %cst_15 = arith.constant 0.797884583 : f32
      %21 = vector.broadcast %cst_15 : f32 to vector<16x128xf32>
      %22 = arith.mulf %21, %20 : vector<16x128xf32>
      %cst_16 = arith.constant 5.000000e-01 : f32
      %23 = vector.broadcast %cst_16 : f32 to vector<16x128xf32>
      %24 = arith.mulf %23, %15 : vector<16x128xf32>
      %25 = math.tanh %22 : vector<16x128xf32>
      %cst_17 = arith.constant 1.000000e+00 : f32
      %26 = vector.broadcast %cst_17 : f32 to vector<16x128xf32>
      %27 = arith.addf %26, %25 : vector<16x128xf32>
      %28 = arith.mulf %24, %27 : vector<16x128xf32>
      %c0_18 = arith.constant 0 : index
      %c0_19 = arith.constant 0 : index
      %29 = vector.load %arg6[%c0_18, %c0_19] : memref<16x128xf32, #tpu.memory_space<vmem>>, vector<16x128xf32>
      tpu.vector_store %arg6[%c0_18, %c0_19], %28 {strides = array<i32>} : memref<16x128xf32, #tpu.memory_space<vmem>>, vector<16x128xf32>,
    } else {
    }
    return
  }
  func.func @transform_0(%arg0: i32, %arg1: i32, %arg2: i32) -> (i32, i32) {
    %c0_i32 = arith.constant 0 : i32
    return %arg0, %arg2 : i32, i32
  }
  func.func @transform_1(%arg0: i32, %arg1: i32, %arg2: i32) -> (i32, i32) {
    %c0_i32 = arith.constant 0 : i32
    return %arg2, %arg1 : i32, i32
  }
  func.func @transform_2(%arg0: i32, %arg1: i32, %arg2: i32) -> (i32, i32) {
    %c0_i32 = arith.constant 0 : i32
    %c0_i32_0 = arith.constant 0 : i32
    return %c0_i32, %arg1 : i32, i32
  }
  func.func @transform_3(%arg0: i32, %arg1: i32, %arg2: i32) -> (i32, i32) {
    %c0_i32 = arith.constant 0 : i32
    return %arg0, %arg1 : i32, i32
  }
}

</mosaic_0001>

<bundles_post_ra>
// kernel: tpu_custom_call.1
= control target key start
LH: loop header
LB: loop body
LE: loop exit
PB: predicated region body
PF: predicated region fallthrough
CT: control target
= control target key end

     0   :  { %8 = vsyncpa [#allocation4], 0  ;;  %s377_s0 = inlined_call_operand.hbm [shape: f32[16,32], index: 0, kind: input, shape index: {}]   ;;  %s378_s1 = inlined_call_operand.hbm [shape: f32[32,128], index: 1, kind: input, shape index: {}]   ;;  %s379_s2 = inlined_call_operand.vmem [shape: f32[1,128], index: 2, kind: input, shape index: {}]   ;;  %s380_s3 = inlined_call_operand.hbm [shape: f32[16,128], index: 3, kind: output, shape index: {}]  }
   0x1   :  { %9 = vsyncpa [#allocation7], 0 }
   0x2   :  { %10 = vsyncpa [#allocation5], 0  ;;  %s304_s12 = smov [#allocation3]   ;;  %s232_s16 = scalar_lea.hbm %s377_s0, 256 }
   0x3   :  { %s16_s13 = sshll.u32 %s304_s12, 4  ;;  %p233_p0 = scmp.ne.s32.totalorder %s377_s0, %s232_s16  ;;  %s17_s13 = int_to_ptr.vmem [resolvable:$true] %s16_s13 }
   0x4   :  { %p236_p1 = scmp.lt.u32.totalorder %s232_s16, %s377_s0 }
   0x6   :  { %p238_p2 = pnand %p236_p1, %p233_p0 }
   0x8   :  { %241 = shalt.err (!%p238_p2)
}
   0x9   :  { %s242_s21 = scalar_lea.vmem %s17_s13, 256  ;;  %p247_p4 = scmp.lt.s32.totalorder %s17_s13, %s17_s13 }
   0xa   :  { %p243_p3 = scmp.ne.s32.totalorder %s17_s13, %s242_s21  ;;  %p248_p5 = scmp.lt.s32.totalorder %s242_s21, %s242_s21 }
   0xc   :  { %p249_p6 = por %p248_p5, %p247_p4 }
   0xe   :  { %p250_p7 = pnand %p249_p6, %p243_p3 }
  0x10   :  { %253 = shalt.err (!%p250_p7)
}
  0x11   :  { %s305_s22 = smov 128   ;;  %s306_s23 = smov 8  }
  0x12   :  { %22 = dma.hbm_to_vmem [thread:$0]  %s377_s0, 256, %s17_s13, [#allocation4], %s305_s22, %s305_s22, %s306_s23  }
  0x13   :  { %s307_s26 = smov [#allocation6]   ;;  %s254_s30 = scalar_lea.hbm %s378_s1, 512 }
  0x14   :  { %s28_s27 = sshll.u32 %s307_s26, 4  ;;  %p255_p8 = scmp.ne.s32.totalorder %s378_s1, %s254_s30  ;;  %s29_s27 = int_to_ptr.vmem [resolvable:$true] %s28_s27 }
  0x15   :  { %p258_p9 = scmp.lt.u32.totalorder %s254_s30, %s378_s1 }
  0x17   :  { %p260_p10 = pnand %p258_p9, %p255_p8 }
  0x19   :  { %263 = shalt.err (!%p260_p10)
}
  0x1a   :  { %s264_s8 = scalar_lea.vmem %s29_s27, 512  ;;  %p269_p12 = scmp.lt.s32.totalorder %s29_s27, %s29_s27 }
  0x1b   :  { %p265_p11 = scmp.ne.s32.totalorder %s29_s27, %s264_s8  ;;  %p270_p13 = scmp.lt.s32.totalorder %s264_s8, %s264_s8 }
  0x1d   :  { %p271_p0 = por %p270_p13, %p269_p12 }
  0x1f   :  { %p272_p1 = pnand %p271_p0, %p265_p11 }
  0x21   :  { %275 = shalt.err (!%p272_p1)
}
  0x22   :  { %34 = dma.hbm_to_vmem [thread:$0]  %s378_s1, 512, %s29_s27, [#allocation7], %s305_s22, %s305_s22, %s306_s23  }
  0x23   :  { %298 = dma.done.wait [#allocation4], 256  }
  0x24   :  { %299 = vsyncadd [#allocation4], 4294967040 }
  0x25   :  { %300 = dma.done.wait [#allocation7], 512  }
  0x26   :  { %301 = vsyncadd [#allocation7], 4294966784  ;;  %vm57_vm0 = vcmask 261120   ;;  %v53_v0 = vld [vmem:[#allocation6] sm:$0xff]  ;;  %v54_v1 = vld [vmem:[#allocation6 + $0x8] sm:$0xff] }
  0x27   :  { %v55_v2 = vld [vmem:[#allocation6 + $0x10] sm:$0xff]  ;;  %v215_v3 = vpack.c.bf16 %v54_v1, %v53_v0  ;;  %v56_v4 = vld [vmem:[#allocation6 + $0x18] sm:$0xff] }
  0x28   :  { %v51_v5 = vld [vmem:[#allocation3] sm:$0xff]  ;;  %v219_v6 = vpack.c.bf16 %v56_v4, %v55_v2  ;;  %v52_v7 = vld [vmem:[#allocation3 + $0x8] sm:$0xff] }
  0x29   :  { %212 = vmatprep.mubr.msk.f32.mxu0 %vm57_vm0, %v51_v5  ;;  %216 = vmatprep.subr.bf16.mxu0 %v215_v3  ;;  %v197_v8 = vld [vmem:[%s379_s2] ss:$0 sm:$0xff]  ;;  %s308_s2 = smov [#allocation8]  }
  0x2a   :  { %218 = vmatpush3.bf16.msra.mxu0 %v215_v3  ;;  %s182_s11 = sshll.u32 %s308_s2, 4  ;;  %s183_s11 = int_to_ptr.vmem [resolvable:$true] %s182_s11 }
  0x2b   :  { %220 = vmatprep.subr.bf16.mxu0 %v219_v6  ;;  %s276_s12 = scalar_lea.vmem %s183_s11, 256  ;;  %p281_p3 = scmp.lt.s32.totalorder %s183_s11, %s183_s11 }
  0x2c   :  { %p277_p2 = scmp.ne.s32.totalorder %s183_s11, %s276_s12  ;;  %p282_p4 = scmp.lt.s32.totalorder %s276_s12, %s276_s12 }
  0x2e   :  { %222 = vmatpush3.bf16.msra.mxu0 %v219_v6  ;;  %p283_p5 = por %p282_p4, %p281_p3 }
  0x30   :  { %p284_p6 = pnand %p283_p5, %p277_p2 }
  0x31   :  { %213 = vmatmul.mubr.msk.f32.vlgmr.msra.gmra.mrb[0].mxu0 %vm57_vm0, %v52_v7 }
 0x104   :  { %v214_v9 = vpop.f32.mrb[0].mxu0 }
 0x105   :  { %v156_v10 = vadd.f32 %v214_v9, %v197_v8  ;;  %v130_v11 = vpop.f32.mrb[1].mxu0 }
 0x106   :  { %v155_v12 = vadd.f32 %v197_v8, %v130_v11 }
 0x107   :  { %v158_v13 = vmul.f32 %v156_v10, %v156_v10  ;;  %v168_v25 = vmul.f32 0.5, %v156_v10 }
 0x108   :  { %v157_v14 = vmul.f32 %v155_v12, %v155_v12  ;;  %v167_v27 = vmul.f32 0.5, %v155_v12 }
 0x109   :  { %v160_v15 = vmul.f32 %v158_v13, %v156_v10 }
 0x10a   :  { %v159_v16 = vmul.f32 %v157_v14, %v155_v12 }
 0x10b   :  { %v162_v17 = vmul.f32 0.044715, %v160_v15 }
 0x10c   :  { %v161_v18 = vmul.f32 0.044715, %v159_v16 }
 0x10d   :  { %v164_v19 = vadd.f32 %v162_v17, %v156_v10 }
 0x10e   :  { %v163_v20 = vadd.f32 %v161_v18, %v155_v12 }
 0x10f   :  { %v166_v21 = vmul.f32 0.7978846, %v164_v19 }
 0x110   :  { %v165_v22 = vmul.f32 0.7978846, %v163_v20 }
 0x111   :  { %228 = vtanh.f32 %v166_v21 }
 0x112   :  { %230 = vtanh.f32 %v165_v22 }
 0x11b   :  { %v229_v23 = vpop.eup %228 }
 0x11c   :  { %v231_v24 = vpop.eup %230  ;;  %v172_v26 = vadd.f32 1.0, %v229_v23 }
 0x11d   :  { %v171_v28 = vadd.f32 1.0, %v231_v24 }
 0x11e   :  { %v174_v29 = vmul.f32 %v172_v26, %v168_v25 }
 0x11f   :  { %v173_v30 = vmul.f32 %v171_v28, %v167_v27 }
 0x120   :  { %176 = vst [vmem:[#allocation8 + $0x8] sm:$0xff] %v174_v29 }
 0x121   :  { %175 = vst [vmem:[#allocation8] sm:$0xff] %v173_v30 }
 0x122   :  { %287 = shalt.err (!%p284_p6)
}
 0x123   :  { %s288_s15 = scalar_lea.hbm %s380_s3, 256 }
 0x124   :  { %p289_p7 = scmp.ne.s32.totalorder %s380_s3, %s288_s15  ;;  %p292_p8 = scmp.lt.u32.totalorder %s288_s15, %s380_s3 }
 0x126   :  { %p294_p9 = pnand %p292_p8, %p289_p7 }
 0x128   :  { %297 = shalt.err (!%p294_p9)
}
 0x129   :  { %188 = dma.vmem_to_hbm [thread:$0]  %s183_s11, 256, %s380_s3, [#allocation5], %s305_s22, %s305_s22, %s306_s23  }
 0x12a   :  { %302 = dma.done.wait [#allocation5], 256  }
 0x12b   :  { %303 = vsyncadd [#allocation5], 4294967040 }
 0x12c   :  { %192 = vsyncpa [#allocation4], 1 }
 0x12d   :  { %193 = vsyncpa [#allocation7], 1 }
 0x12e   :  { %194 = vsyncpa [#allocation5], 1 }

</bundles_post_ra>
